<compile_context>
chip_gen: v7x
topology: tpu7x:2x2x1
jax: 0.10.0
libtpu: 0.0.40
codegen_flags: <defaults>
</compile_context>

<pallas_src>
import functools

import jax
import jax.numpy as jnp
from jax import lax
from jax.experimental import pallas as pl
from jax.experimental.pallas import tpu as pltpu

_BIG = 1e30  # pushes padded-class squared-norms out of every hinge / gather


def _round_up(n, m):
    return (n + m - 1) // m * m


def _pick_tile(n, c_pad, d, cap=256):
    """Largest 8-multiple tile keeping ~6 live (tile, max(C,D)) f32 temporaries
    under ~24 MiB (sized for v7x's 64 MiB VMEM; v5e/v6e have more headroom)."""
    limit = (24 * 2 ** 20) // (6 * 4 * max(c_pad, d, 128))
    limit = max(8, (limit // 8) * 8)
    return max(8, min(cap, limit, _round_up(n, 8)))


def _vmem_estimate(tile_b, tile_o, c_pad, d):
    f = 4  # f32 / i32 bytes
    io = 2 * f * (tile_b * d + tile_b * 128 + c_pad * d + tile_o * d + 8 * 128)
    scratch = f * (8 * 128 + tile_b * 128 + tile_b * d)
    temps = 8 * f * tile_b * max(c_pad, tile_o, 128)
    return io + scratch + temps


def _pad_rows(a, rows):
    if a.shape[0] == rows:
        return a
    return jnp.zeros((rows,) + a.shape[1:], a.dtype).at[: a.shape[0]].set(a)


def _nirvana_kernel(labels_ref, x_ref, c_ref, xo_ref,        # inputs
                    out_ref,                                  # output
                    acc_ref, bias_ref, clab_ref,              # scratch
                    *, margin, num_classes, b_actual, bo_actual,
                    tile_b, tile_o, has_outlier, ramp):
    bi = pl.program_id(0)
    oi = pl.program_id(1)
    n_o = pl.num_programs(1)

    # lane-dense (8,128) accumulator slab: [0,0]=intra, [0,1]=inter, [0,2]=outlier
    r8 = lax.broadcasted_iota(jnp.int32, (8, 128), 0)
    c128 = lax.broadcasted_iota(jnp.int32, (8, 128), 1)

    # row validity (handles padding of B up to a tile multiple)
    row_ids = lax.broadcasted_iota(jnp.int32, (tile_b, 1), 0) + bi * tile_b
    valid_b = (row_ids < b_actual).astype(jnp.float32)            # (tb, 1)

    dn = (((1,), (1,)), ((), ()))   # contract the last (feature) dim of both

    # ------------- inlier terms: once per B tile ---------------------------
    @pl.when(oi == 0)
    def _inlier():
        x = x_ref[...]                                            # (tb, D)
        c = c_ref[...]                                            # (Cp, D)
        labels = labels_ref[...]                                  # (tb, 1) i32
        d = x.shape[1]
        c_pad = c.shape[0]
        ones_row = jnp.ones((1, d), jnp.float32)

        x_sq = jnp.sum(x * x, axis=1, keepdims=True)              # (tb, 1)
        # ||c_j||^2 directly in lane layout (no transpose); padded classes get
        # a huge bias so they never win a hinge or a gather.
        c_sq_row = lax.dot_general(ones_row, c * c, dn,
                                   preferred_element_type=jnp.float32)  # (1, Cp)
        cls_ids = lax.broadcasted_iota(jnp.int32, (1, c_pad), 1)
        c_sq_row = jnp.where(cls_ids < num_classes, c_sq_row, _BIG)

        xc = lax.dot_general(x, c, dn,
                             preferred_element_type=jnp.float32)  # (tb, Cp)
        distmat = x_sq + c_sq_row - 2.0 * xc                      # (tb, Cp)

        onehot = (lax.broadcasted_iota(jnp.int32, (tile_b, c_pad), 1)
                  == labels).astype(jnp.float32)                  # (tb, Cp)

        intra_rows = jnp.sum(distmat * onehot, axis=1, keepdims=True)  # (tb, 1)
        intra_sum = jnp.sum(intra_rows * valid_b)

        # Unmasked class hinge; the j == y_i term is exactly max(margin, 0),
        # so the masked sum is recovered in the wrapper by subtracting
        # B * max(margin, 0) -> no (tb, C) mask multiply needed.
        hinge_in = jnp.maximum(margin + intra_rows - distmat, 0.0)
        inter_sum = jnp.sum(hinge_in * valid_b)

        # Gather centers[labels] / ||centers[labels]||^2 for the outlier path
        # (one small one-hot matmul instead of an O(Bo*B*C) odist @ onehot.T).
        c_lab = jnp.dot(onehot, c, preferred_element_type=jnp.float32)  # (tb, D)
        c_sq_lab = jnp.sum(onehot * c_sq_row, axis=1, keepdims=True)    # (tb, 1)
        clab_ref[...] = c_lab
        bias_ref[...] = margin + intra_rows - c_sq_lab

        acc_ref[...] = (jnp.where((r8 == 0) & (c128 == 0), intra_sum, 0.0)
                        + jnp.where((r8 == 0) & (c128 == 1), inter_sum, 0.0))

    # ------------- outlier hinge: every (B tile, B_out tile) pair -----------
    if has_outlier:
        xo = xo_ref[...]                                          # (to, D)
        d = xo.shape[1]
        ones_row = jnp.ones((1, d), jnp.float32)

        xo_sq_row = lax.dot_general(ones_row, xo * xo, dn,
                                    preferred_element_type=jnp.float32)  # (1, to)
        g = lax.dot_general(clab_ref[...], xo, dn,
                            preferred_element_type=jnp.float32)          # (tb, to)
        # margin + ||x_i - c_{y_i}||^2 - ||xo_o - c_{y_i}||^2, kept in (B, Bo)
        # orientation so intra stays in its natural (tb, 1) layout (no intra.T).
        hinge = jnp.maximum(bias_ref[...] - xo_sq_row + 2.0 * g, 0.0)
        if ramp:
            hinge = jnp.minimum(hinge, 60.0)

        col_ids = lax.broadcasted_iota(jnp.int32, (1, tile_o), 1) + oi * tile_o
        valid_o = (col_ids < bo_actual).astype(jnp.float32)       # (1, to)
        out_sum = jnp.sum(hinge * valid_b * valid_o)
        acc_ref[...] += jnp.where((r8 == 0) & (c128 == 2), out_sum, 0.0)

    # ------------- writeback: once per B tile -------------------------------
    @pl.when(oi == n_o - 1)
    def _finalize():
        out_ref[0] = acc_ref[...]


def nirvana_openset_loss(labels, x, x_out, centers, *, margin=48.0, ramp=False,
                         tile_b=None, tile_o=None):
    """JAX/Pallas equivalent of NirvanaOpenset_loss.forward.

    labels: (B,) int in [0, num_classes); x: (B, D); x_out: (Bo, D) or None;
    centers: (num_classes, D). Returns (intra_loss, inter_loss, outlier|None).
    """
    x = x.astype(jnp.float32)
    centers = centers.astype(jnp.float32)
    labels = labels.astype(jnp.int32)
    b, d = x.shape
    nc = centers.shape[0]
    has_outlier = x_out is not None
    bo = int(x_out.shape[0]) if has_outlier else 1

    # ---- tiling / padding geometry -----------------------------------------
    c_pad = _round_up(nc, 128)                      # lane-dense class axis
    tile_b = (_pick_tile(b, c_pad, d) if tile_b is None
              else max(8, _round_up(int(tile_b), 8)))
    b_pad = _round_up(b, tile_b)
    if has_outlier:
        tile_o = (_pick_tile(bo, c_pad, d) if tile_o is None
                  else max(8, _round_up(int(tile_o), 8)))
        bo_pad = _round_up(bo, tile_o)
    else:
        tile_o, bo_pad = 8, 8
    n_b = b_pad // tile_b
    n_o = bo_pad // tile_o if has_outlier else 1

    # ---- padded operands -----------------------------------------------------
    labels_p = _pad_rows(labels.reshape(b, 1), b_pad)
    x_p = _pad_rows(x, b_pad)
    centers_p = _pad_rows(centers, c_pad)
    if has_outlier:
        xo_p = _pad_rows(x_out.astype(jnp.float32), bo_pad)
    else:
        # tiny dummy tile; never read in the kernel (has_outlier is static)
        xo_p = jnp.zeros((bo_pad, d), jnp.float32)

    kernel = functools.partial(
        _nirvana_kernel, margin=float(margin), num_classes=nc,
        b_actual=b, bo_actual=bo, tile_b=tile_b, tile_o=tile_o,
        has_outlier=has_outlier, ramp=bool(ramp))

    est = _vmem_estimate(tile_b, tile_o, c_pad, d)
    vmem_limit = int(min(48 * 2 ** 20, max(4 * est, 32 * 2 ** 20)))

    grid_spec = pltpu.PrefetchScalarGridSpec(
        num_scalar_prefetch=0,
        grid=(n_b, n_o),
        in_specs=[
            pl.BlockSpec((tile_b, 1), lambda i, j: (i, 0)),    # labels
            pl.BlockSpec((tile_b, d), lambda i, j: (i, 0)),    # x
            pl.BlockSpec((c_pad, d), lambda i, j: (0, 0)),     # centers (resident)
            pl.BlockSpec((tile_o, d), lambda i, j: (j, 0)),    # x_out
        ],
        out_specs=pl.BlockSpec((1, 8, 128), lambda i, j: (i, 0, 0)),
        scratch_shapes=[
            pltpu.VMEM((8, 128), jnp.float32),       # per-B-tile loss partials
            pltpu.VMEM((tile_b, 1), jnp.float32),    # margin + intra - ||c_y||^2
            pltpu.VMEM((tile_b, d), jnp.float32),    # centers[labels]
        ],
    )

    partials = pl.pallas_call(
        kernel,
        out_shape=jax.ShapeDtypeStruct((n_b, 8, 128), jnp.float32),
        grid_spec=grid_spec,
        compiler_params=pltpu.CompilerParams(
            dimension_semantics=("parallel", "arbitrary"),
            vmem_limit_bytes=vmem_limit),
    )(labels_p, x_p, centers_p, xo_p)

    intra_loss = jnp.sum(partials[:, 0, 0]) / (b * d * 2.0)
    inter_sum = jnp.sum(partials[:, 0, 1]) - b * max(float(margin), 0.0)
    inter_loss = inter_sum / (nc * b * 2.0)
    outlier_loss = (jnp.sum(partials[:, 0, 2]) / (b * bo * 2.0)
                    if has_outlier else None)
    return intra_loss, inter_loss, outlier_loss


def _reference(labels, x, x_out, centers, margin=48.0, ramp=False):
    """Plain-JAX reference mirroring the PyTorch forward."""
    hp = jax.lax.Precision.HIGHEST
    b, d = x.shape
    nc = centers.shape[0]
    distmat = (jnp.sum(x ** 2, 1, keepdims=True)
               + jnp.sum(centers ** 2, 1, keepdims=True).T
               - 2.0 * jnp.dot(x, centers.T, precision=hp))
    intra = jnp.take_along_axis(distmat, labels[:, None], axis=1)[:, 0]
    intra_loss = intra.sum() / (b * d * 2.0)
    cdi = intra[:, None] - distmat
    mask = 1.0 - jax.nn.one_hot(labels, nc, dtype=jnp.float32)
    inter_loss = (jnp.maximum(margin + cdi, 0.0) * mask).sum() / (nc * b * 2.0)
    if x_out is None:
        return intra_loss, inter_loss, None
    bo = x_out.shape[0]
    odist = (jnp.sum(x_out ** 2, 1, keepdims=True)
             + jnp.sum(centers ** 2, 1, keepdims=True).T
             - 2.0 * jnp.dot(x_out, centers.T, precision=hp))
    ocorr = odist[:, labels]                                  # (Bo, B)
    hinge = jnp.maximum(margin + (intra[None, :] - ocorr), 0.0)
    if ramp:
        hinge = jnp.minimum(hinge, 60.0)
    outl_loss = hinge.sum() / (b * bo * 2.0)
    return intra_loss, inter_loss, outl_loss


if __name__ == "__main__":
    num_classes = 4
    feat_dim = 32
    batch = 12         # deliberately NOT a tile multiple -> exercises row masks
    batch_out = 20     # exercises Bo tiling + padding masks
    margin = 48.0

    key = jax.random.PRNGKey(0)
    k_c, k_x, k_xo, k_lbl = jax.random.split(key, 4)
    centers = jax.random.normal(k_c, (num_classes, feat_dim), jnp.float32)
    x = jax.random.normal(k_x, (batch, feat_dim), jnp.float32)
    x_out = jax.random.normal(k_xo, (batch_out, feat_dim), jnp.float32)
    labels = jax.random.randint(k_lbl, (batch,), 0, num_classes, jnp.int32)

    # label-range validity (host-side; mirrors the module's ValueError check)
    assert int(labels.max()) < num_classes and int(labels.min()) >= 0

    ok = True
    # forced 8-row tiles -> 2x3 grid with padded rows on both axes
    for ramp, xo in ((False, x_out), (True, x_out), (False, None)):
        got = nirvana_openset_loss(labels, x, xo, centers, margin=margin,
                                   ramp=ramp, tile_b=8, tile_o=8)
        jax.block_until_ready([g for g in got if g is not None])
        want = _reference(labels, x, xo, centers, margin=margin, ramp=ramp)
        for g, w in zip(got, want):
            if (g is None) != (w is None):
                ok = False
            elif g is not None:
                ok = ok and bool(jnp.allclose(g, w, rtol=1e-4, atol=1e-4))

    # default (auto) tile sizes
    got = nirvana_openset_loss(labels, x, x_out, centers, margin=margin)
    jax.block_until_ready([g for g in got if g is not None])
    want = _reference(labels, x, x_out, centers, margin=margin)
    for g, w in zip(got, want):
        ok = ok and bool(jnp.allclose(g, w, rtol=1e-4, atol=1e-4))

    if not ok:
        raise SystemExit("mismatch vs reference")
    print("KERNEL_OK")
</pallas_src>

<mosaic_0001>
module attributes {stable_mosaic.version = 11 : i64} {
  func.func @_nirvana_kernel(%arg0: i32, %arg1: i32, %arg2: memref<8x1xi32, #tpu.memory_space<vmem>>, %arg3: memref<8x32xf32, #tpu.memory_space<vmem>>, %arg4: memref<128x32xf32, #tpu.memory_space<vmem>>, %arg5: memref<8x32xf32, #tpu.memory_space<vmem>>, %arg6: memref<1x8x128xf32, #tpu.memory_space<vmem>>, %arg7: memref<8x128xf32, #tpu.memory_space<vmem>>, %arg8: memref<8x1xf32, #tpu.memory_space<vmem>>, %arg9: memref<8x32xf32, #tpu.memory_space<vmem>>) attributes {dimension_semantics = [#tpu.dimension_semantics<parallel>, #tpu.dimension_semantics<arbitrary>], iteration_bounds = array<i64: 2, 3>, scalar_prefetch = 0 : i64, scratch_operands = 3 : i64, tpu.core_type = #tpu.core_type<tc>, window_params = [{transform_indices = @transform_0, window_bounds = array<i64: 8, 1>}, {transform_indices = @transform_1, window_bounds = array<i64: 8, 32>}, {pipeline_mode = #tpu.pipeline_mode<synchronous>, transform_indices = @transform_2, window_bounds = array<i64: 128, 32>}, {transform_indices = @transform_3, window_bounds = array<i64: 8, 32>}, {transform_indices = @transform_4, window_bounds = array<i64: 1, 8, 128>}]} {
    %0 = tpu.iota {dimensions = array<i32: 0>} : vector<8x128xi32>
    %1 = tpu.iota {dimensions = array<i32: 1>} : vector<8x128xi32>
    %2 = tpu.iota {dimensions = array<i32: 0>} : vector<8x1xi32>
    %c8_i32 = arith.constant 8 : i32
    %3 = arith.muli %arg0, %c8_i32 : i32
    %4 = vector.broadcast %3 : i32 to vector<8x1xi32>
    %5 = arith.addi %2, %4 : vector<8x1xi32>
    %c12_i32 = arith.constant 12 : i32
    %6 = vector.broadcast %c12_i32 : i32 to vector<8x1xi32>
    %7 = arith.cmpi slt, %5, %6 : vector<8x1xi32>
    %8 = arith.extui %7 : vector<8x1xi1> to vector<8x1xi32>
    %9 = arith.sitofp %8 : vector<8x1xi32> to vector<8x1xf32>
    %c0_i32 = arith.constant 0 : i32
    %10 = arith.cmpi eq, %arg1, %c0_i32 : i32
    %11 = arith.extui %10 : i1 to i32
    %c0_i32_0 = arith.constant 0 : i32
    %12 = arith.cmpi ne, %11, %c0_i32_0 : i32
    scf.if %12 {
      %c0_20 = arith.constant 0 : index
      %c0_21 = arith.constant 0 : index
      %58 = vector.load %arg3[%c0_20, %c0_21] : memref<8x32xf32, #tpu.memory_space<vmem>>, vector<8x32xf32>
      %c0_22 = arith.constant 0 : index
      %c0_23 = arith.constant 0 : index
      %59 = vector.load %arg4[%c0_22, %c0_23] : memref<128x32xf32, #tpu.memory_space<vmem>>, vector<128x32xf32>
      %c0_24 = arith.constant 0 : index
      %c0_25 = arith.constant 0 : index
      %60 = vector.load %arg2[%c0_24, %c0_25] : memref<8x1xi32, #tpu.memory_space<vmem>>, vector<8x1xi32>
      %cst_26 = arith.constant 1.000000e+00 : f32
      %61 = vector.broadcast %cst_26 : f32 to vector<1x32xf32>
      %62 = arith.mulf %58, %58 : vector<8x32xf32>
      %cst_27 = arith.constant dense<0.000000e+00> : vector<8xf32>
      %63 = vector.multi_reduction <add>, %62, %cst_27 [1] : vector<8x32xf32> to vector<8xf32>
      %64 = vector.shape_cast %63 : vector<8xf32> to vector<8x1xf32>
      %65 = arith.mulf %59, %59 : vector<128x32xf32>
      %cst_28 = arith.constant dense<0.000000e+00> : vector<1x128xf32>
      %66 = tpu.matmul %61, %65, %cst_28 {dimension_numbers = #tpu.dot_dimension_numbers<[1], [1], [0], [0], [0, 0, 1, 0], [], []>} : vector<1x32xf32>, vector<128x32xf32>, vector<1x128xf32> -> vector<1x128xf32>
      %67 = tpu.iota {dimensions = array<i32: 1>} : vector<1x128xi32>
      %c4_i32 = arith.constant 4 : i32
      %68 = vector.broadcast %c4_i32 : i32 to vector<1x128xi32>
      %69 = arith.cmpi slt, %67, %68 : vector<1x128xi32>
      %cst_29 = arith.constant 1.000000e+30 : f32
      %70 = vector.broadcast %cst_29 : f32 to vector<1x128xf32>
      %71 = arith.select %69, %66, %70 : vector<1x128xi1>, vector<1x128xf32>
      %cst_30 = arith.constant dense<0.000000e+00> : vector<8x128xf32>
      %72 = tpu.matmul %58, %59, %cst_30 {dimension_numbers = #tpu.dot_dimension_numbers<[1], [1], [0], [0], [0, 0, 1, 0], [], []>} : vector<8x32xf32>, vector<128x32xf32>, vector<8x128xf32> -> vector<8x128xf32>
      %73 = vector.broadcast %64 : vector<8x1xf32> to vector<8x128xf32>
      %74 = vector.broadcast %71 : vector<1x128xf32> to vector<8x128xf32>
      %75 = arith.addf %73, %74 : vector<8x128xf32>
      %cst_31 = arith.constant 2.000000e+00 : f32
      %76 = vector.broadcast %cst_31 : f32 to vector<8x128xf32>
      %77 = arith.mulf %76, %72 : vector<8x128xf32>
      %78 = arith.subf %75, %77 : vector<8x128xf32>
      %79 = tpu.iota {dimensions = array<i32: 1>} : vector<8x128xi32>
      %80 = vector.broadcast %60 : vector<8x1xi32> to vector<8x128xi32>
      %81 = arith.cmpi eq, %79, %80 : vector<8x128xi32>
      %82 = arith.extui %81 : vector<8x128xi1> to vector<8x128xi32>
      %83 = arith.sitofp %82 : vector<8x128xi32> to vector<8x128xf32>
      %84 = arith.mulf %78, %83 : vector<8x128xf32>
      %cst_32 = arith.constant dense<0.000000e+00> : vector<8xf32>
      %85 = vector.multi_reduction <add>, %84, %cst_32 [1] : vector<8x128xf32> to vector<8xf32>
      %86 = vector.shape_cast %85 : vector<8xf32> to vector<8x1xf32>
      %87 = arith.mulf %86, %9 : vector<8x1xf32>
      %88 = vector.shape_cast %87 : vector<8x1xf32> to vector<1x8x1xf32>
      %cst_33 = arith.constant dense<0.000000e+00> : vector<1xf32>
      %89 = vector.multi_reduction <add>, %88, %cst_33 [1, 2] : vector<1x8x1xf32> to vector<1xf32>
      %90 = vector.shape_cast %89 : vector<1xf32> to vector<1x1x1xf32>
      %91 = vector.extract %90[0, 0, 0] : f32 from vector<1x1x1xf32>
      %cst_34 = arith.constant 4.800000e+01 : f32
      %92 = vector.broadcast %cst_34 : f32 to vector<8x1xf32>
      %93 = arith.addf %92, %86 : vector<8x1xf32>
      %94 = vector.broadcast %93 : vector<8x1xf32> to vector<8x128xf32>
      %95 = arith.subf %94, %78 : vector<8x128xf32>
      %cst_35 = arith.constant 0.000000e+00 : f32
      %96 = vector.broadcast %cst_35 : f32 to vector<8x128xf32>
      %97 = arith.maximumf %95, %96 : vector<8x128xf32>
      %98 = vector.broadcast %9 : vector<8x1xf32> to vector<8x128xf32>
      %99 = arith.mulf %97, %98 : vector<8x128xf32>
      %100 = vector.shape_cast %99 : vector<8x128xf32> to vector<1x8x128xf32>
      %cst_36 = arith.constant dense<0.000000e+00> : vector<1xf32>
      %101 = vector.multi_reduction <add>, %100, %cst_36 [1, 2] : vector<1x8x128xf32> to vector<1xf32>
      %102 = vector.shape_cast %101 : vector<1xf32> to vector<1x1x1xf32>
      %103 = vector.extract %102[0, 0, 0] : f32 from vector<1x1x1xf32>
      %cst_37 = arith.constant dense<0.000000e+00> : vector<8x32xf32>
      %104 = tpu.matmul %83, %59, %cst_37 {dimension_numbers = #tpu.dot_dimension_numbers<[1], [0], [0], [1], [0, 0, 1, 1], [], []>} : vector<8x128xf32>, vector<128x32xf32>, vector<8x32xf32> -> vector<8x32xf32>
      %105 = vector.broadcast %71 : vector<1x128xf32> to vector<8x128xf32>
      %106 = arith.mulf %83, %105 : vector<8x128xf32>
      %cst_38 = arith.constant dense<0.000000e+00> : vector<8xf32>
      %107 = vector.multi_reduction <add>, %106, %cst_38 [1] : vector<8x128xf32> to vector<8xf32>
      %108 = vector.shape_cast %107 : vector<8xf32> to vector<8x1xf32>
      %c0_39 = arith.constant 0 : index
      %c0_40 = arith.constant 0 : index
      %109 = vector.load %arg9[%c0_39, %c0_40] : memref<8x32xf32, #tpu.memory_space<vmem>>, vector<8x32xf32>
      tpu.vector_store %arg9[%c0_39, %c0_40], %104 {strides = array<i32>} : memref<8x32xf32, #tpu.memory_space<vmem>>, vector<8x32xf32>,
      %cst_41 = arith.constant 4.800000e+01 : f32
      %110 = vector.broadcast %cst_41 : f32 to vector<8x1xf32>
      %111 = arith.addf %110, %86 : vector<8x1xf32>
      %112 = arith.subf %111, %108 : vector<8x1xf32>
      %c0_42 = arith.constant 0 : index
      %c0_43 = arith.constant 0 : index
      %113 = vector.load %arg8[%c0_42, %c0_43] : memref<8x1xf32, #tpu.memory_space<vmem>>, vector<8x1xf32>
      tpu.vector_store %arg8[%c0_42, %c0_43], %112 {strides = array<i32>} : memref<8x1xf32, #tpu.memory_space<vmem>>, vector<8x1xf32>,
      %c0_i32_44 = arith.constant 0 : i32
      %114 = vector.broadcast %c0_i32_44 : i32 to vector<8x128xi32>
      %115 = arith.cmpi eq, %0, %114 : vector<8x128xi32>
      %c0_i32_45 = arith.constant 0 : i32
      %116 = vector.broadcast %c0_i32_45 : i32 to vector<8x128xi32>
      %117 = arith.cmpi eq, %1, %116 : vector<8x128xi32>
      %118 = arith.andi %115, %117 : vector<8x128xi1>
      %cst_46 = arith.constant 0.000000e+00 : f32
      %119 = vector.broadcast %91 : f32 to vector<8x128xf32>
      %120 = vector.broadcast %cst_46 : f32 to vector<8x128xf32>
      %121 = arith.select %118, %119, %120 : vector<8x128xi1>, vector<8x128xf32>
      %c0_i32_47 = arith.constant 0 : i32
      %122 = vector.broadcast %c0_i32_47 : i32 to vector<8x128xi32>
      %123 = arith.cmpi eq, %0, %122 : vector<8x128xi32>
      %c1_i32 = arith.constant 1 : i32
      %124 = vector.broadcast %c1_i32 : i32 to vector<8x128xi32>
      %125 = arith.cmpi eq, %1, %124 : vector<8x128xi32>
      %126 = arith.andi %123, %125 : vector<8x128xi1>
      %cst_48 = arith.constant 0.000000e+00 : f32
      %127 = vector.broadcast %103 : f32 to vector<8x128xf32>
      %128 = vector.broadcast %cst_48 : f32 to vector<8x128xf32>
      %129 = arith.select %126, %127, %128 : vector<8x128xi1>, vector<8x128xf32>
      %130 = arith.addf %121, %129 : vector<8x128xf32>
      %c0_49 = arith.constant 0 : index
      %c0_50 = arith.constant 0 : index
      %131 = vector.load %arg7[%c0_49, %c0_50] : memref<8x128xf32, #tpu.memory_space<vmem>>, vector<8x128xf32>
      tpu.vector_store %arg7[%c0_49, %c0_50], %130 {strides = array<i32>} : memref<8x128xf32, #tpu.memory_space<vmem>>, vector<8x128xf32>,
    } else {
    }
    %c0 = arith.constant 0 : index
    %c0_1 = arith.constant 0 : index
    %13 = vector.load %arg5[%c0, %c0_1] : memref<8x32xf32, #tpu.memory_space<vmem>>, vector<8x32xf32>
    %cst = arith.constant 1.000000e+00 : f32
    %14 = vector.broadcast %cst : f32 to vector<1x32xf32>
    %15 = arith.mulf %13, %13 : vector<8x32xf32>
    %cst_2 = arith.constant dense<0.000000e+00> : vector<1x8xf32>
    %16 = tpu.matmul %14, %15, %cst_2 {dimension_numbers = #tpu.dot_dimension_numbers<[1], [1], [0], [0], [0, 0, 1, 0], [], []>} : vector<1x32xf32>, vector<8x32xf32>, vector<1x8xf32> -> vector<1x8xf32>
    %c0_3 = arith.constant 0 : index
    %c0_4 = arith.constant 0 : index
    %17 = vector.load %arg9[%c0_3, %c0_4] : memref<8x32xf32, #tpu.memory_space<vmem>>, vector<8x32xf32>
    %cst_5 = arith.constant dense<0.000000e+00> : vector<8x8xf32>
    %18 = tpu.matmul %17, %13, %cst_5 {dimension_numbers = #tpu.dot_dimension_numbers<[1], [1], [0], [0], [0, 0, 1, 0], [], []>} : vector<8x32xf32>, vector<8x32xf32>, vector<8x8xf32> -> vector<8x8xf32>
    %c0_6 = arith.constant 0 : index
    %c0_7 = arith.constant 0 : index
    %19 = vector.load %arg8[%c0_6, %c0_7] : memref<8x1xf32, #tpu.memory_space<vmem>>, vector<8x1xf32>
    %20 = vector.broadcast %19 : vector<8x1xf32> to vector<8x8xf32>
    %21 = vector.broadcast %16 : vector<1x8xf32> to vector<8x8xf32>
    %22 = arith.subf %20, %21 : vector<8x8xf32>
    %cst_8 = arith.constant 2.000000e+00 : f32
    %23 = vector.broadcast %cst_8 : f32 to vector<8x8xf32>
    %24 = arith.mulf %23, %18 : vector<8x8xf32>
    %25 = arith.addf %22, %24 : vector<8x8xf32>
    %cst_9 = arith.constant 0.000000e+00 : f32
    %26 = vector.broadcast %cst_9 : f32 to vector<8x8xf32>
    %27 = arith.maximumf %25, %26 : vector<8x8xf32>
    %28 = tpu.iota {dimensions = array<i32: 1>} : vector<1x8xi32>
    %c8_i32_10 = arith.constant 8 : i32
    %29 = arith.muli %arg1, %c8_i32_10 : i32
    %30 = vector.broadcast %29 : i32 to vector<1x8xi32>
    %31 = arith.addi %28, %30 : vector<1x8xi32>
    %c20_i32 = arith.constant 20 : i32
    %32 = vector.broadcast %c20_i32 : i32 to vector<1x8xi32>
    %33 = arith.cmpi slt, %31, %32 : vector<1x8xi32>
    %34 = arith.extui %33 : vector<1x8xi1> to vector<1x8xi32>
    %35 = arith.sitofp %34 : vector<1x8xi32> to vector<1x8xf32>
    %36 = vector.broadcast %9 : vector<8x1xf32> to vector<8x8xf32>
    %37 = arith.mulf %27, %36 : vector<8x8xf32>
    %38 = vector.broadcast %35 : vector<1x8xf32> to vector<8x8xf32>
    %39 = arith.mulf %37, %38 : vector<8x8xf32>
    %40 = vector.shape_cast %39 : vector<8x8xf32> to vector<1x8x8xf32>
    %cst_11 = arith.constant dense<0.000000e+00> : vector<1xf32>
    %41 = vector.multi_reduction <add>, %40, %cst_11 [1, 2] : vector<1x8x8xf32> to vector<1xf32>
    %42 = vector.shape_cast %41 : vector<1xf32> to vector<1x1x1xf32>
    %43 = vector.extract %42[0, 0, 0] : f32 from vector<1x1x1xf32>
    %c0_12 = arith.constant 0 : index
    %c0_13 = arith.constant 0 : index
    %44 = vector.load %arg7[%c0_12, %c0_13] : memref<8x128xf32, #tpu.memory_space<vmem>>, vector<8x128xf32>
    %c0_i32_14 = arith.constant 0 : i32
    %45 = vector.broadcast %c0_i32_14 : i32 to vector<8x128xi32>
    %46 = arith.cmpi eq, %0, %45 : vector<8x128xi32>
    %c2_i32 = arith.constant 2 : i32
    %47 = vector.broadcast %c2_i32 : i32 to vector<8x128xi32>
    %48 = arith.cmpi eq, %1, %47 : vector<8x128xi32>
    %49 = arith.andi %46, %48 : vector<8x128xi1>
    %cst_15 = arith.constant 0.000000e+00 : f32
    %50 = vector.broadcast %43 : f32 to vector<8x128xf32>
    %51 = vector.broadcast %cst_15 : f32 to vector<8x128xf32>
    %52 = arith.select %49, %50, %51 : vector<8x128xi1>, vector<8x128xf32>
    %53 = arith.addf %44, %52 : vector<8x128xf32>
    %c0_16 = arith.constant 0 : index
    %c0_17 = arith.constant 0 : index
    %54 = vector.load %arg7[%c0_16, %c0_17] : memref<8x128xf32, #tpu.memory_space<vmem>>, vector<8x128xf32>
    tpu.vector_store %arg7[%c0_16, %c0_17], %53 {strides = array<i32>} : memref<8x128xf32, #tpu.memory_space<vmem>>, vector<8x128xf32>,
    %c2_i32_18 = arith.constant 2 : i32
    %55 = arith.cmpi eq, %arg1, %c2_i32_18 : i32
    %56 = arith.extui %55 : i1 to i32
    %c0_i32_19 = arith.constant 0 : i32
    %57 = arith.cmpi ne, %56, %c0_i32_19 : i32
    scf.if %57 {
      %c0_20 = arith.constant 0 : index
      %c0_21 = arith.constant 0 : index
      %58 = vector.load %arg7[%c0_20, %c0_21] : memref<8x128xf32, #tpu.memory_space<vmem>>, vector<8x128xf32>
      %c0_22 = arith.constant 0 : index
      %c0_23 = arith.constant 0 : index
      %c0_24 = arith.constant 0 : index
      %59 = vector.load %arg6[%c0_22, %c0_23, %c0_24] : memref<1x8x128xf32, #tpu.memory_space<vmem>>, vector<1x8x128xf32>
      %60 = vector.shape_cast %59 : vector<1x8x128xf32> to vector<8x128xf32>
      %61 = vector.shape_cast %58 : vector<8x128xf32> to vector<1x8x128xf32>
      tpu.vector_store %arg6[%c0_22, %c0_23, %c0_24], %61 {strides = array<i32>} : memref<1x8x128xf32, #tpu.memory_space<vmem>>, vector<1x8x128xf32>,
    } else {
    }
    return
  }
  func.func @transform_0(%arg0: i32, %arg1: i32) -> (i32, i32) {
    %c0_i32 = arith.constant 0 : i32
    %c0_i32_0 = arith.constant 0 : i32
    return %arg0, %c0_i32 : i32, i32
  }
  func.func @transform_1(%arg0: i32, %arg1: i32) -> (i32, i32) {
    %c0_i32 = arith.constant 0 : i32
    %c0_i32_0 = arith.constant 0 : i32
    return %arg0, %c0_i32 : i32, i32
  }
  func.func @transform_2(%arg0: i32, %arg1: i32) -> (i32, i32) {
    %c0_i32 = arith.constant 0 : i32
    %c0_i32_0 = arith.constant 0 : i32
    %c0_i32_1 = arith.constant 0 : i32
    return %c0_i32, %c0_i32_0 : i32, i32
  }
  func.func @transform_3(%arg0: i32, %arg1: i32) -> (i32, i32) {
    %c0_i32 = arith.constant 0 : i32
    %c0_i32_0 = arith.constant 0 : i32
    return %arg1, %c0_i32 : i32, i32
  }
  func.func @transform_4(%arg0: i32, %arg1: i32) -> (i32, i32, i32) {
    %c0_i32 = arith.constant 0 : i32
    %c0_i32_0 = arith.constant 0 : i32
    %c0_i32_1 = arith.constant 0 : i32
    return %arg0, %c0_i32, %c0_i32_0 : i32, i32, i32
  }
}

</mosaic_0001>

<bundles_post_ra>
// kernel: tpu_custom_call.1
= control target key start
LH: loop header
LB: loop body
LE: loop exit
PB: predicated region body
PF: predicated region fallthrough
CT: control target
= control target key end

     0   :  { %9 = vsyncpa [#allocation6], 0  ;;  %s1835_s0 = inlined_call_operand.vmem [shape: s32[16,1], index: 0, kind: input, shape index: {}]   ;;  %s1836_s1 = inlined_call_operand.vmem [shape: f32[16,32], index: 1, kind: input, shape index: {}]   ;;  %s1837_s2 = inlined_call_operand.vmem [shape: f32[128,32], index: 2, kind: input, shape index: {}]   ;;  %s1838_s3 = inlined_call_operand.vmem [shape: f32[24,32], index: 3, kind: input, shape index: {}]   ;;  %s1839_s4 = inlined_call_operand.hbm [shape: f32[2,8,128], index: 4, kind: output, shape index: {}]  }
   0x1   :  { %11 = vsyncpa [#allocation6 + $0x1], 0  ;;  %s1511_s15 = smov 0   ;;  %s1513_s16 = smov 0  }
   0x2   :  { %s1515_s17 = smov 0   ;;  %s1517_s18 = smov 0  }
   0x3   :  { %s1519_s19 = smov 0   ;;  %s1521_s20 = smov 0  }
   0x4   :  { %s1523_s21 = smov 0   ;;  %s1525_s22 = smov 0  }
   0x5 LB: > { %s975_s23 = sadd.s32 4294967295, %s1474_s22   ;;  %s976_s24 = sadd.s32 4294967294, %s1474_s22   ;;  %s1474_s22 = sphi %s1525_s22, %s17_s22   ;;  %s1470_s21 = sphi %s1523_s21, %s1855_s21   ;;  %s1466_s20 = sphi %s1521_s20, %s1854_s20   ;;  %s1462_s19 = sphi %s1519_s19, %s1853_s19   ;;  %s1458_s18 = sphi %s1517_s18, %s1852_s18   ;;  %s1454_s17 = sphi %s1515_s17, %s1851_s17   ;;  %s1450_s16 = sphi %s1513_s16, %s1850_s16   ;;  %s1446_s15 = sphi %s1511_s15, %s1849_s15  }
   0x6   : > { %s26_s25 = sadd.s32 1, %s1466_s20  ;;  %s29_s26 = sadd.s32 1, %s1470_s21 }
   0x7   : > { %p27_p0 = scmp.ge.s32.totalorder %s26_s25, 3  ;;  %p145_p1 = scmp.ne.s32.totalorder %s1454_s17, %s1450_s16 }
   0x8   : > { %p146_p2 = scmp.eq.s32.totalorder %s975_s23, 5  ;;  %p151_p4 = scmp.ne.s32.totalorder %s1450_s16, %s1446_s15 }
   0x9   : > { %s1857_s25 = smov (%p27_p0, %s26_s25), 0  ;;  %s1859_s26 = smov (!%p27_p0, %s29_s26), %s1470_s21 }
   0xa   : > { %p1560_p3 = por %p146_p2, %p145_p1  ;;  %p31_p5 = scmp.ge.s32.totalorder %s1859_s26, 2 }
   0xb   : > { %p152_p6 = scmp.eq.s32.totalorder %s976_s24, 5  ;;  %p979_p7 = scmp.ge.s32.totalorder %s1474_s22, 1 }
   0xc   : > { %p194_p8 = scmp.lt.s32.totalorder %s1474_s22, 7  ;;  %s1861_s26 = smov (%p31_p5, %s1859_s26), 0 }
   0xd   : > { %1843 = sst [smem:[#allocation8_spill]] %s1861_s26  ;;  %p1570_p9 = por %p152_p6, %p151_p4 }
   0xe   : > { %p195_p10 = pnand %p979_p7, %p194_p8  ;;  %s132_s29 = ssub.s32 %s1470_s21, %s1861_s26 }
   0xf   : > { %s135_s30 = sadd.s32 1, %s1454_s17  ;;  %p133_p11 = scmp.eq.s32.totalorder %s132_s29, 0  ;;  %v239_v0 = vlaneseq (!%p195_p10)  ;;  %v1476_v5 = vmov (!%p195_p10), 0.0  }
  0x10   : > { %198 = sbr.rel (%p195_p10) target bundleno = 1146 (0x47a), region = 36  ;;  %s1840_s6 = sand.u32 (!%p195_p10), 1, %s1450_s16  }
  0x11   : > { %s1578_s5 = scalar_select %p133_p11, %s1454_s17, %s135_s30  }
  0x12   : > { %p227_p12 = scmp.lt.s32.totalorder (!%p195_p10), %s1462_s19, 1  ;;  %s1584_s7 = sshll.u32 (!%p195_p10), %s1840_s6, 3  ;;  %v1587_v1 = vshrl.u32 (!%p195_p10), %v239_v0, 7  ;;  %v1589_v2 = vand.u32 (!%p195_p10), 127, %v239_v0 }
  0x13   : > { %p235_p13 = scmp.lt.s32.totalorder (!%p195_p10), %s1458_s18, 2  ;;  %s984_s8 = sshll.u32 (!%p195_p10), %s1462_s19, 3 }
  0x14   : > { %v244_v3 = vstv (!%p195_p10), %s984_s8  ;;  %s226_s26 = scalar_lea.vmem (!%p195_p10), [#allocation5], %s1584_s7  ;;  %p986_p0 = scmp.ne.s32.totalorder (!%p195_p10), %s1458_s18, 0 }
  0x15   : > { %v245_v4 = vadd.s32 (!%p195_p10), %v244_v3, %v1587_v1 }
  0x17   : > { %s228_s9 = scalar_select %p227_p12, %s1462_s19, 1  ;;  %vm246_vm0 = vcmp.lt.s32.totalorder %v245_v4, 12 }
  0x18   : > { %s236_s10 = scalar_select %p235_p13, %s1458_s18, 2  ;;  %v1606_v6 = vsel %vm246_vm0, 1.0, %v1476_v5 }
  0x19   : > { %s981_s11 = sshll.u32 %s228_s9, 3  ;;  %252 = sbr.rel (%p986_p0) target bundleno = 673 (0x2a1), region = 40  ;;  %v254_v7 = vld [vmem:[%s1837_s2] sm:$0xff] (!%p986_p0)  ;;  %v255_v8 = vld [vmem:[%s1837_s2 + $0x8] sm:$0xff] (!%p986_p0)  ;;  %vm272_vm1 = vcmask (!%p986_p0), 261120   ;;  %v1477_v9 = vmov (!%p986_p0), 0.0|0.0  }
  0x1a   : > { %s1598_s14 = scalar_lea.vmem %s1835_s0, %s981_s11  ;;  %s1603_s29 = scalar_lea.vmem %s1836_s1, %s981_s11  ;;  %1204 = vmatprep.subr.bf16.mxu0 (!%p986_p0), %v1477_v9  ;;  %v276_v10 = vmul.f32 (!%p986_p0), %v254_v7, %v254_v7  ;;  %v277_v11 = vmul.f32 (!%p986_p0), %v255_v8, %v255_v8  ;;  %1236 = vmatprep.subr.bf16.mxu1 (!%p986_p0), %v1477_v9  ;;  %v1623_v12 = vpack.c.bf16 (!%p986_p0), %v255_v8, %v254_v7  ;;  %vm1627_vm2 = vmpackc.low (!%p986_p0), %vm272_vm1, %vm272_vm1  ;;  %v256_v14 = vld [vmem:[%s1837_s2 + $0x10] sm:$0xff] (!%p986_p0)  ;;  %v257_v15 = vld [vmem:[%s1837_s2 + $0x18] sm:$0xff] (!%p986_p0)  ;;  %vm1478_vm3 = vmmov (!%p986_p0), 0  }
  0x1b   : > { %s983_s30 = sshll.u32 %s236_s10, 3  ;;  %v1479_v16 = vmov (!%p986_p0), 0.0   ;;  %v278_v18 = vmul.f32 (!%p986_p0), %v256_v14, %v256_v14  ;;  %v279_v19 = vmul.f32 (!%p986_p0), %v257_v15, %v257_v15  ;;  %v1646_v20 = vpack.c.bf16 (!%p986_p0), %v257_v15, %v256_v14  ;;  %v1651_v21 = vld [vmem:[%s1603_s29] sm:$0xff] (!%p986_p0)  ;;  %v259_v25 = vld [vmem:[%s1837_s2 + $0x28] sm:$0xff] (!%p986_p0)  ;;  %v260_v32 = vld [vmem:[%s1837_s2 + $0x30] sm:$0xff] (!%p986_p0) }
  0x1c   : > { %s1611_s9 = scalar_lea.vmem %s1838_s3, %s983_s30  ;;  %1121 = vmatprep.mubr.msk.f32.mxu0 (!%p986_p0), %vm1478_vm3, %v1479_v16  ;;  %v1205_v17 = vpack.c.bf16 (!%p986_p0), %v277_v11, %v276_v10  ;;  %1239 = vmatpush3.bf16.xpose.msk.msra.mxu1 (!%p986_p0), %vm1627_vm2, %v1623_v12  ;;  %v271_v23 = vmul.f32 (!%p986_p0), %v1651_v21, %v1651_v21  ;;  %v258_v24 = vld [vmem:[%s1837_s2 + $0x20] sm:$0xff] (!%p986_p0)  ;;  %v1480_v26 = vmov (!%p986_p0), 0   ;;  %v281_v29 = vmul.f32 (!%p986_p0), %v259_v25, %v259_v25  ;;  %v261_v33 = vld [vmem:[%s1837_s2 + $0x38] sm:$0xff] (!%p986_p0)  ;;  %v263_v39 = vld [vmem:[%s1837_s2 + $0x48] sm:$0xff] (!%p986_p0) }
  0x1d   : > { %1240 = vmatprep.subr.bf16.mxu1 (!%p986_p0), %v1477_v9  ;;  %1156 = vmatprep.mubr.msk.f32.mxu1 (!%p986_p0), %vm1478_vm3, %v1479_v16  ;;  %v1209_v22 = vpack.c.bf16 (!%p986_p0), %v279_v19, %v278_v18  ;;  %v280_v28 = vmul.f32 (!%p986_p0), %v258_v24, %v258_v24  ;;  %v1669_v30 = vpack.c.bf16 (!%p986_p0), %v259_v25, %v258_v24  ;;  %v262_v38 = vld [vmem:[%s1837_s2 + $0x40] sm:$0xff] (!%p986_p0)  ;;  %v264_v45 = vld [vmem:[%s1837_s2 + $0x50] sm:$0xff] (!%p986_p0)  ;;  %v265_v46 = vld [vmem:[%s1837_s2 + $0x58] sm:$0xff] (!%p986_p0)  ;;  %v1481_v63 = vmov (!%p986_p0), 1.0  }
  0x1e   : > { %1207 = vmatpush3.bf16.xpose.msk.msra.mxu0 (!%p986_p0), %vm1627_vm2, %v1205_v17  ;;  %1378 = vset.pattern.permute.xlu0 (!%p986_p0), %v1480_v26  ;;  %v273_v27 = vsel (!%p986_p0), %vm272_vm1, %v271_v23, 0.0  ;;  %v282_v34 = vmul.f32 (!%p986_p0), %v260_v32, %v260_v32  ;;  %v283_v35 = vmul.f32 (!%p986_p0), %v261_v33, %v261_v33  ;;  %v1249_v36 = vpack.c.bf16 (!%p986_p0), %v261_v33, %v260_v32  ;;  %v270_v43 = vld [vmem:[%s1598_s14] sm:$0xff] (!%p986_p0)  ;;  %v267_v52 = vld [vmem:[%s1837_s2 + $0x68] sm:$0xff] (!%p986_p0)  ;;  %v268_v57 = vld [vmem:[%s1837_s2 + $0x70] sm:$0xff] (!%p986_p0) }
  0x1f   : > { %1208 = vmatprep.subr.bf16.mxu0 (!%p986_p0), %v1477_v9  ;;  %274 = vadd.xlane.f32.xlu0 (!%p986_p0), %v273_v27  ;;  %v1213_v31 = vpack.c.bf16 (!%p986_p0), %v281_v29, %v280_v28  ;;  %v284_v40 = vmul.f32 (!%p986_p0), %v262_v38, %v262_v38  ;;  %v285_v41 = vmul.f32 (!%p986_p0), %v263_v39, %v263_v39  ;;  %v266_v51 = vld [vmem:[%s1837_s2 + $0x60] sm:$0xff] (!%p986_p0)  ;;  %v269_v58 = vld [vmem:[%s1837_s2 + $0x78] sm:$0xff] (!%p986_p0)  ;;  %vm413_vm5 = vcmp.lt.s32.totalorder (!%p986_p0), %v1589_v2, 4 }
  0x20   : > { %v1217_v37 = vpack.c.bf16 %v283_v35, %v282_v34  ;;  %v1253_v42 = vpack.c.bf16 %v263_v39, %v262_v38  ;;  %v286_v47 = vmul.f32 %v264_v45, %v264_v45  ;;  %v287_v48 = vmul.f32 %v265_v46, %v265_v46 }
  0x21   : > { %v1221_v44 = vpack.c.bf16 %v285_v41, %v284_v40  ;;  %v1257_v49 = vpack.c.bf16 %v265_v46, %v264_v45  ;;  %v288_v53 = vmul.f32 %v266_v51, %v266_v51  ;;  %v289_v54 = vmul.f32 %v267_v52, %v267_v52 }
  0x22   : > { %v1225_v50 = vpack.c.bf16 %v287_v48, %v286_v47  ;;  %v1261_v55 = vpack.c.bf16 %v267_v52, %v266_v51  ;;  %v290_v59 = vmul.f32 %v268_v57, %v268_v57  ;;  %v291_v60 = vmul.f32 %v269_v58, %v269_v58 }
  0x23   : > { %v1229_v56 = vpack.c.bf16 %v289_v54, %v288_v53  ;;  %v1265_v61 = vpack.c.bf16 %v269_v58, %v268_v57  ;;  %v538_v4 = vsub.s32 0, %v1587_v1  ;;  %vm553_vm6 = vcmask 7168  }
  0x24   : > { %1243 = vmatpush3.bf16.xpose.msk.msra.mxu1 %vm1627_vm2, %v1646_v20  ;;  %v1233_v62 = vpack.c.bf16 %v291_v60, %v290_v59  ;;  %vm653_vm7 = vcmp.eq.s32.totalorder %v1587_v1, 0  ;;  %vm654_vm8 = vcmp.eq.s32.totalorder %v1589_v2, 0  ;;  %vm658_vm9 = vcmp.eq.s32.totalorder %v1589_v2, 1 }
  0x25   : > { %1244 = vmatprep.subr.bf16.mxu1 %v1477_v9  ;;  %vm655_vm10 = vmand %vm653_vm7, %vm654_vm8 }
  0x26   : > { %1211 = vmatpush3.bf16.xpose.msk.msra.mxu0 %vm1627_vm2, %v1209_v22  ;;  %vm659_vm11 = vmand %vm653_vm7, %vm658_vm9 }
  0x27   : > { %1212 = vmatprep.subr.bf16.mxu0 %v1477_v9 }
  0x2c   : > { %1247 = vmatpush3.bf16.xpose.msk.msra.mxu1 %vm1627_vm2, %v1669_v30 }
  0x2d   : > { %1248 = vmatprep.subr.bf16.mxu1 %v1477_v9 }
  0x2e   : > { %1215 = vmatpush3.bf16.xpose.msk.msra.mxu0 %vm1627_vm2, %v1213_v31 }
  0x2f   : > { %1216 = vmatprep.subr.bf16.mxu0 %v1477_v9 }
  0x34   : > { %1251 = vmatpush3.bf16.xpose.msk.msra.mxu1 %vm1627_vm2, %v1249_v36 }
  0x35   : > { %1252 = vmatprep.subr.bf16.mxu1 %v1477_v9  ;;  %544 = vperm.xlu0 %1378, %v270_v43  }
  0x36   : > { %1219 = vmatpush3.bf16.xpose.msk.msra.mxu0 %vm1627_vm2, %v1217_v37 }
  0x37   : > { %1220 = vmatprep.subr.bf16.mxu0 %v1477_v9 }
  0x3c   : > { %1255 = vmatpush3.bf16.xpose.msk.msra.mxu1 %vm1627_vm2, %v1253_v42 }
  0x3d   : > { %1256 = vmatprep.subr.bf16.mxu1 %v1477_v9 }
  0x3e   : > { %1223 = vmatpush3.bf16.xpose.msk.msra.mxu0 %vm1627_vm2, %v1221_v44 }
  0x3f   : > { %1224 = vmatprep.subr.bf16.mxu0 %v1477_v9 }
  0x44   : > { %1259 = vmatpush3.bf16.xpose.msk.msra.mxu1 %vm1627_vm2, %v1257_v49 }
  0x45   : > { %1260 = vmatprep.subr.bf16.mxu1 %v1477_v9 }
  0x46   : > { %1227 = vmatpush3.bf16.xpose.msk.msra.mxu0 %vm1627_vm2, %v1225_v50 }
  0x47   : > { %1228 = vmatprep.subr.bf16.mxu0 %v1477_v9 }
  0x4c   : > { %1263 = vmatpush3.bf16.xpose.msk.msra.mxu1 %vm1627_vm2, %v1261_v55 }
  0x4d   : > { %1264 = vmatprep.subr.bf16.mxu1 %v1477_v9 }
  0x4e   : > { %1231 = vmatpush3.bf16.xpose.msk.msra.mxu0 %vm1627_vm2, %v1229_v56 }
  0x4f   : > { %1232 = vmatprep.subr.bf16.mxu0 %v1477_v9 }
  0x54   : > { %1267 = vmatpush3.bf16.xpose.msk.msra.mxu1 %vm1627_vm2, %v1265_v61 }
  0x56   : > { %1235 = vmatpush3.bf16.xpose.msk.msra.mxu0 %vm1627_vm2, %v1233_v62 }
  0x57   : > { %1268 = vmatprep.subr.bf16.mxu0 %v1477_v9 }
  0x5b   : > { %1157 = vmatmul.mubr.msk.f32.vlgmr.msra.gmra.mrb[0].mxu1 %vm272_vm1, %v1651_v21 }
  0x5d   : > { %1122 = vmatmul.mubr.msk.f32.vlgmr.msra.gmra.mrb[0].mxu0 %vm272_vm1, %v1481_v63 }
  0x5e   : > { %1270 = vmatpush3.bf16.msra.mxu0 %v1623_v12  ;;  %1191 = vmatprep.mubr.msk.f32.mxu0 %vm1478_vm3, %v1479_v16 }
  0x5f   : > { %1271 = vmatprep.subr.bf16.mxu0 %v1477_v9 }
  0x62   : > { %1273 = vmatpush3.bf16.msra.mxu0 %v1646_v20 }
  0x63   : > { %1274 = vmatprep.subr.bf16.mxu0 %v1477_v9 }
  0x66   : > { %1276 = vmatpush3.bf16.msra.mxu0 %v1669_v30 }
  0x67   : > { %1277 = vmatprep.subr.bf16.mxu0 %v1477_v9 }
  0x6a   : > { %1279 = vmatpush3.bf16.msra.mxu0 %v1249_v36 }
  0x6b   : > { %1280 = vmatprep.subr.bf16.mxu0 %v1477_v9 }
  0x6e   : > { %1282 = vmatpush3.bf16.msra.mxu0 %v1253_v42 }
  0x6f   : > { %1283 = vmatprep.subr.bf16.mxu0 %v1477_v9 }
  0x72   : > { %1285 = vmatpush3.bf16.msra.mxu0 %v1257_v49 }
  0x73   : > { %1286 = vmatprep.subr.bf16.mxu0 %v1477_v9 }
  0x76   : > { %1288 = vmatpush3.bf16.msra.mxu0 %v1261_v55 }
  0x77   : > { %1289 = vmatprep.subr.bf16.mxu0 %v1477_v9 }
  0x7a   : > { %1291 = vmatpush3.bf16.msra.mxu0 %v1265_v61 }
  0xac   : > { %v275_v0 = vpop.xlane.xlu0 %274 }
  0xb4   : > { %v545_v3 = vpop.permute.xlu0 %544 }
  0xb5   : > { %vm546_vm4 = vcmp.eq.s32.totalorder %v1589_v2, %v545_v3 }
  0xb6   : > { %1192 = vmatmul.mubr.msk.f32.vlgmr.msra.gmra.mrb[2].mxu0 %vm546_vm4, %v1481_v63  ;;  %v1021_v13 = vsel %vm546_vm4, 1.0, %v1479_v16 }
 0x12e   : > { %v532_v7 = vpop.f32.mrb[0].mxu1 }
 0x12f   : > { %v1158_v8 = vpop.f32.mrb[1].mxu1  ;;  %v541_v15 = vmul.f32 2.0, %v532_v7 }
 0x130   : > { %v409_v10 = vpop.f32.mrb[0].mxu0 }
 0x131   : > { %v414_v11 = vsel %vm413_vm5, %v409_v10, 1e+30  ;;  %v1123_v12 = vpop.f32.mrb[1].mxu0 }
 0x132   : > { %v539_v14 = vrot.slane %v414_v11, %v538_v4 }
 0x134   : > { %v540_v9 = vadd.f32 %v539_v14, %v275_v0  ;;  %v647_v17 = vmul.f32 %v1021_v13, %v539_v14 }
 0x136   : > { %v542_v18 = vsub.f32 %v540_v9, %v541_v15 }
 0x138   : > { %v549_v19 = vmul.f32 %v1021_v13, %v542_v18 }
 0x13a   : > { %550 = vadd.xlane.f32.xlu1 %v549_v19 }
 0x189   : > { %v643_v20 = vpop.f32.mrb[2].mxu0 }
 0x18a   : > { %650 = vst.msk [vmem:[#allocation4] sm:$0xff] %vm272_vm1, %v643_v20  ;;  %v1193_v21 = vpop.f32.mrb[3].mxu0 }
 0x1c7   : > { %v551_v22 = vpop.xlane.xlu1 %550 }
 0x1c8   : > { %v552_v23 = vmul.f32 %v1606_v6, %v551_v22  ;;  %v564_v24 = vadd.f32 48.0, %v551_v22 }
 0x1ca   : > { %v554_v25 = vsel %vm553_vm6, %v552_v23, 0.0  ;;  %v565_v26 = vsub.f32 %v564_v24, %v542_v18 }
 0x1cb   : > { %555 = vadd.xlane.f32.xlu1 %v554_v25 }
 0x1cc   : > { %v566_v16 = vmax.f32 %v565_v26, 0.0 }
 0x1ce   : > { %v567_v27 = vmul.f32 %v1606_v6, %v566_v16 }
 0x1d0   : > { %568 = vadd.xlane.f32.xlu1 %v567_v27 }
 0x1d4   : > { %648 = vadd.xlane.f32.xlu1 %v647_v17 }
 0x258   : > { %v556_v28 = vpop.xlane.xlu1 %555 }
 0x259   : > { %v557_v29 = vrot.slane %v556_v28, 4 }
 0x25b   : > { %v558_v30 = vadd.f32 %v557_v29, %v556_v28 }
 0x25d   : > { %v559_v31 = vrot.slane %v558_v30, 2  ;;  %v569_v32 = vpop.xlane.xlu1 %568 }
 0x25e   : > { %v570_v33 = vrot.slane %v569_v32, 4 }
 0x25f   : > { %v560_v34 = vadd.f32 %v559_v31, %v558_v30 }
 0x260   : > { %v571_v35 = vadd.f32 %v570_v33, %v569_v32 }
 0x261   : > { %v649_v36 = vpop.xlane.xlu1 %648  ;;  %v561_v37 = vrot.slane %v560_v34, 1 }
 0x262   : > { %v572_v38 = vrot.slane %v571_v35, 2  ;;  %v651_v39 = vsub.f32 %v564_v24, %v649_v36 }
 0x263   : > { %v562_v40 = vadd.f32 %v561_v37, %v560_v34 }
 0x264   : > { %652 = vst.msk [vmem:[#allocation3] sm:$0xff] %vm553_vm6, %v651_v39  ;;  %v573_v41 = vadd.f32 %v572_v38, %v571_v35 }
 0x265   : > { %1292 = vpush %v562_v40 }
 0x266   : > { %v574_v42 = vrot.slane %v573_v41, 1 }
 0x268   : > { %v575_v43 = vadd.f32 %v574_v42, %v573_v41 }
 0x26a   : > { %1294 = vpush %v575_v43 }
 0x296   : > { %s1293_s11 = spop %1292 }
 0x297   : > { %v656_v44 = vstv %s1293_s11 }
 0x298   : > { %v657_v46 = vsel %vm655_vm10, %v656_v44, 0.0 }
 0x29b   : > { %s1295_s29 = spop %1294 }
 0x29c   : > { %v660_v45 = vstv %s1295_s29 }
 0x29d   : > { %v661_v47 = vsel %vm659_vm11, %v660_v45, 0.0 }
 0x29e   : > { %v662_v48 = vadd.f32 %v661_v47, %v657_v46 }
 0x2a0   : > { %663 = vst [vmem:[#allocation2] sm:$0xff] %v662_v48 }
 0x2a1 PF: > { %1194 = vmatprep.subr.mxu0 %v1476_v5  ;;  %v664_v49 = vld [vmem:[%s1611_s9] sm:$0xff]  ;;  %vm666_vm12 = vcmask 261120   ;;  %1199 = vmatprep.subr.mxu1 %v1476_v5  ;;  %vm1482_vm13 = vmmov 0   ;;  %v820_v52 = vld [vmem:[#allocation3] sm:$0xff]  ;;  %v1483_v53 = vmov 0   ;;  %v1484_v54 = vmov 1.0  }
 0x2a2   : > { %v665_v50 = vmul.f32 %v664_v49, %v664_v49  ;;  %1200 = vmatpush3.xpose.msk.msra.mxu1 %vm666_vm12, %v664_v49  ;;  %1196 = vmatprep.mubr.msk.f32.mxu0 %vm1482_vm13, %v1476_v5  ;;  %v743_v51 = vld [vmem:[#allocation4] sm:$0xff]  ;;  %s1027_s9 = sshll.u32 %s1458_s18, 3  ;;  %v828_v55 = vsub.s32 0, %v1587_v1  ;;  %vm842_vm15 = vcmask 64512   ;;  %vm854_vm0 = vcmp.eq.s32.totalorder %v1587_v1, 0  ;;  %p1029_p1 = scmp.ne.s32.totalorder %s1458_s18, 2 }
 0x2a3   : > { %1201 = vmatprep.mubr.msk.f32.mxu1 %vm1482_vm13, %v1476_v5  ;;  %1379 = vset.pattern.permute.xlu0 %v1483_v53  ;;  %v835_v57 = vstv %s1027_s9  ;;  %vm855_vm1 = vcmp.eq.s32.totalorder %v1589_v2, 2 }
 0x2a4   : > { %1195 = vmatpush3.xpose.msk.msra.mxu0 %vm666_vm12, %v665_v50  ;;  %823 = vperm.xlu0 %1379, %v820_v52   ;;  %v836_v0 = vadd.s32 %v835_v57, %v1589_v2  ;;  %vm856_vm2 = vmand %vm854_vm0, %vm855_vm1 }
 0x2a5   : > { %1202 = vmatmul.mubr.msk.f32.vlgmr.msra.gmra.mrb[0].mxu1 %vm666_vm12, %v743_v51 }
 0x2a6   : > { %vm837_vm14 = vcmp.lt.s32.totalorder %v836_v0, 20 }
 0x2a7   : > { %1197 = vmatmul.mubr.msk.f32.vlgmr.msra.gmra.mrb[0].mxu0 %vm666_vm12, %v1484_v54  ;;  %v1028_v8 = vsel %vm837_vm14, 1.0, %v1476_v5  ;;  %v853_v5 = vld [vmem:[#allocation2] sm:$0xff] }
 0x323   : > { %v824_v60 = vpop.permute.xlu0 %823 }
 0x378   : > { %v816_v56 = vpop.f32.mrb[0].mxu1 }
 0x379   : > { %v1203_v58 = vpop.f32.mrb[1].mxu1  ;;  %v831_v63 = vmul.f32 2.0, %v816_v56 }
 0x37a   : > { %v739_v59 = vpop.f32.mrb[0].mxu0 }
 0x37b   : > { %v829_v61 = vrot.slane %v739_v59, %v828_v55  ;;  %v1198_v62 = vpop.f32.mrb[1].mxu0 }
 0x37d   : > { %v830_v3 = vsub.f32 %v824_v60, %v829_v61 }
 0x37f   : > { %v832_v4 = vadd.f32 %v831_v63, %v830_v3 }
 0x381   : > { %v833_v7 = vmax.f32 %v832_v4, 0.0 }
 0x383   : > { %v840_v10 = vmul.f32 %v1606_v6, %v833_v7 }
 0x385   : > { %v841_v11 = vmul.f32 %v1028_v8, %v840_v10 }
 0x387   : > { %v843_v12 = vsel %vm842_vm15, %v841_v11, 0.0 }
 0x388   : > { %844 = vadd.xlane.f32.xlu0 %v843_v12 }
 0x415   : > { %v845_v13 = vpop.xlane.xlu0 %844 }
 0x416   : > { %v846_v14 = vrot.slane %v845_v13, 4 }
 0x418   : > { %v847_v15 = vadd.f32 %v846_v14, %v845_v13 }
 0x41a   : > { %v848_v9 = vrot.slane %v847_v15, 2 }
 0x41c   : > { %v849_v17 = vadd.f32 %v848_v9, %v847_v15 }
 0x41e   : > { %v850_v18 = vrot.slane %v849_v17, 1 }
 0x420   : > { %v851_v19 = vadd.f32 %v850_v18, %v849_v17 }
 0x422   : > { %1296 = vpush %v851_v19 }
 0x452   : > { %864 = sbr.rel (%p1029_p1) target bundleno = 1121 (0x461), region = 44 }
 0x453   : > { %s1297_s23 = spop %1296 }
 0x454   : > { %v857_v6 = vstv %s1297_s23 }
 0x455   : > { %v858_v20 = vsel %vm856_vm2, %v857_v6, 0.0 }
 0x456   : > { %v859_v21 = vadd.f32 %v858_v20, %v853_v5 }
 0x458   : > { %860 = vst [vmem:[#allocation2] sm:$0xff] %v859_v21 }
 0x45f   : > { %v865_v22 = vld [vmem:[#allocation2] sm:$0xff] }
 0x460   : > { %866 = vst [vmem:[%s226_s26] sm:$0xff] %v865_v22 }
 0x461 PF: > { %s1031_s14 = sshll.u32 %s1462_s19, 7  ;;  %s881_s30 = sshll.u32 %s226_s26, 4  ;;  %s882_s30 = int_to_ptr.vmem [resolvable:$true] %s881_s30 }
 0x462   : > { %s1784_s24 = scalar_lea.hbm %s1839_s4, %s1031_s14  ;;  %s1847_s18 = sand.u32 1, %s1450_s16  }
 0x463   : > { %s868_s8 = scalar_lea.sflag [#allocation6], %s1847_s18  ;;  %s1380_s12 = scalar_lea.vmem %s882_s30, 128 }
 0x464   : > { %p1381_p2 = scmp.ne.s32.totalorder %s882_s30, %s1380_s12  ;;  %s1485_s13 = smov [#allocation5]  }
 0x465   : > { %s1384_s11 = sshll.u32 %s1485_s13, 4  ;;  %s1385_s11 = int_to_ptr.vmem [resolvable:$false] %s1384_s11 }
 0x466   : > { %p1382_p4 = pnand %p1381_p2, %p1560_p3  ;;  %s1386_s29 = scalar_lea.vmem %s1385_s11, 256 }
 0x467   : > { %p1387_p6 = scmp.lt.s32.totalorder %s882_s30, %s1385_s11  ;;  %p1388_p7 = scmp.lt.s32.totalorder %s1386_s29, %s1380_s12 }
 0x468   : > { %p1383_p5 = pneg %p1382_p4 }
 0x469   : > { %p1389_p8 = por %p1388_p7, %p1387_p6 }
 0x46b   : > { %p1390_p10 = pnand %p1389_p8, %p1383_p5 }
 0x46d   : > { %1393 = shalt.err (!%p1390_p10)
}
 0x46e   : > { %s1394_s19 = scalar_lea.hbm %s1784_s24, 128  ;;  %s1398_s9 = scalar_lea.hbm %s1839_s4, 256 }
 0x46f   : > { %p1395_p11 = scmp.ne.s32.totalorder %s1784_s24, %s1394_s19  ;;  %p1399_p0 = scmp.lt.u32.totalorder %s1784_s24, %s1839_s4 }
 0x470   : > { %p1400_p1 = scmp.lt.u32.totalorder %s1398_s9, %s1394_s19  ;;  %p1402_p4 = scmp.lt.u32.totalorder %s1394_s19, %s1784_s24 }
 0x471   : > { %p1396_p12 = pnand %p1395_p11, %p1560_p3 }
 0x472   : > { %p1401_p2 = por %p1400_p1, %p1399_p0 }
 0x473   : > { %p1397_p13 = pneg %p1396_p12 }
 0x474   : > { %p1403_p5 = por %p1402_p4, %p1401_p2 }
 0x476   : > { %p1404_p6 = pnand %p1403_p5, %p1397_p13 }
 0x478   : > { %1407 = shalt.err (!%p1404_p6)
}
 0x479   : > { %1298 = dma.vmem_to_hbm [thread:$0]  (%p1560_p3), %s882_s30, 128, %s1784_s24, %s868_s8  }
 0x47a PF: > { %p1304_p7 = scmp.ge.s32.totalorder %s1474_s22, 2  ;;  %s893_s6 = sand.u32 1, %s1446_s15  }
 0x47b   : > { %s894_s10 = scalar_lea.sflag [#allocation6], %s893_s6 }
 0x47c   : > { %p1301_p8 = pnand %p1304_p7, %p1570_p9 }
 0x47e   : > { %1441 = dma.done.wait (!%p1301_p8), %s894_s10, 128  }
 0x47f   : > { %1443 = vsyncadd (!%p1301_p8), %s894_s10, 4294967168  ;;  %s17_s22 = sadd.s32 1, %s1474_s22   ;;  %s1848_s27 = sld [smem:[#allocation8_spill]] }
 0x480   : > { %p14_p10 = scmp.ge.s32.totalorder %s17_s22, 8   ;;  %s1849_s15 = smov %s1450_s16 }
 0x481   : > { %s1850_s16 = smov %s1454_s17  ;;  %s1851_s17 = smov %s1578_s5 }
 0x482   : > { %s1852_s18 = smov %s1466_s20  ;;  %s1853_s19 = smov %s1470_s21 }
 0x483   : > { %s1854_s20 = smov %s1857_s25  ;;  %16 = sbr.rel (!%p14_p10) target bundleno = 5 (0x5), region = 85 }
 0x485   : > { %s1855_s21 = smov %s1848_s27 }
 0x48a   :  { %899 = vsyncpa [#allocation6], 1 }
 0x48b   :  { %901 = vsyncpa [#allocation6 + $0x1], 1 }

</bundles_post_ra>
